<compile_context>
chip_gen: v7x
topology: tpu7x:2x2x1
jax: 0.10.0
libtpu: 0.0.40
codegen_flags: <defaults>
</compile_context>

<pallas_src>
import functools

import jax
import jax.numpy as jnp
from jax.experimental import pallas as pl
from jax.experimental.pallas import tpu as pltpu


# ---------------------------------------------------------------------------
# Kernel
# ---------------------------------------------------------------------------
def _mlp_kernel(x_ref, w1_ref, b1_ref, w2_ref, b2_ref, w3_ref, b3_ref, o_ref):
    # Fused Linear -> ReLU -> Linear -> ReLU -> (Dropout == id) -> Linear on one tile.
    # Weights arrive as bf16 (pre-cast once); accumulate in f32 on the MXU,
    # keep bias-add / ReLU in f32 on the VPU. Output tile is lane-dense (N=128).
    x = x_ref[...].astype(jnp.bfloat16)
    h1 = jnp.dot(x, w1_ref[...], preferred_element_type=jnp.float32) + b1_ref[...]
    h1 = jnp.maximum(h1, 0.0)
    h2 = jnp.dot(h1.astype(jnp.bfloat16), w2_ref[...],
                 preferred_element_type=jnp.float32) + b2_ref[...]
    h2 = jnp.maximum(h2, 0.0)
    out = jnp.dot(h2.astype(jnp.bfloat16), w3_ref[...],
                  preferred_element_type=jnp.float32) + b3_ref[...]
    o_ref[...] = out.astype(o_ref.dtype)


# ---------------------------------------------------------------------------
# One-time parameter packing
# ---------------------------------------------------------------------------
def _round_up(n, m):
    return -(-n // m) * m


def _pad2(a, rows, cols):
    r, c = a.shape
    return jnp.pad(a, ((0, rows - r), (0, cols - c)))


def prepare_params(params):
    """One-time packing of the parameters for the kernel (call ONCE at init).

    * hidden (64) and out_dim (5) lane dimensions are zero-padded to 128; the zero
      columns stay exactly zero through bias/ReLU/matmul, so results are exact.
      The padded output columns are sliced off once in the wrapper.
    * in_dim is left natural so x needs no pad/cast per call.
    * Weight matrices are stored in bf16 (MXU-native, half the DMA bytes); biases stay f32.
    """
    w1, b1, w2, b2, w3, b3 = (params[k] for k in ("w1", "b1", "w2", "b2", "w3", "b3"))
    in_dim, hidden = w1.shape
    out_dim = w3.shape[1]
    hp = _round_up(hidden, 128)   # 64  -> 128
    op = _round_up(out_dim, 128)  # 5   -> 128 (lane-dense output stores)

    return {
        "w1": _pad2(w1.astype(jnp.float32), in_dim, hp).astype(jnp.bfloat16),
        "b1": _pad2(b1.reshape(1, -1).astype(jnp.float32), 1, hp),
        "w2": _pad2(w2.astype(jnp.float32), hp, hp).astype(jnp.bfloat16),
        "b2": _pad2(b2.reshape(1, -1).astype(jnp.float32), 1, hp),
        "w3": _pad2(w3.astype(jnp.float32), hp, op).astype(jnp.bfloat16),
        "b3": _pad2(b3.reshape(1, -1).astype(jnp.float32), 1, op),
        "out_dim": int(out_dim),  # static metadata, stripped before jit
    }


# ---------------------------------------------------------------------------
# Tiling policy (per-generation, computed outside jit from static shapes)
# ---------------------------------------------------------------------------
_MAX_BATCH_TILE = 4096


def _num_tensorcores_per_chip():
    try:
        kind = jax.devices()[0].device_kind.lower()
    except Exception:  # pragma: no cover - defensive only
        return 1
    # v7x has 2 TensorCores per chip; v4/v5p expose a megacore that
    # dimension_semantics=("parallel",) can split across.
    if any(tag in kind for tag in ("v7", "v4", "v5p")):
        return 2
    return 1


def _choose_batch_tile(B):
    """Return None for a single resident block, else the batch tile size."""
    if _num_tensorcores_per_chip() >= 2:
        # Give each TensorCore one maximal tile: exactly 2 grid steps for
        # mid/large batches; truly tiny batches stay single-block.
        if B <= 256:
            return None
        return min(_MAX_BATCH_TILE, _round_up(pl.cdiv(B, 2), 8))
    # Single TensorCore: every grid step is pure serial overhead, so use one
    # block whenever it fits and only tile beyond _MAX_BATCH_TILE rows.
    if B <= _MAX_BATCH_TILE:
        return None
    return _MAX_BATCH_TILE


# ---------------------------------------------------------------------------
# Forward
# ---------------------------------------------------------------------------
@functools.partial(jax.jit, static_argnames=("out_dim", "batch_tile"))
def _forward_jit(x, pparams, *, out_dim, batch_tile):
    w1, b1, w2, b2, w3, b3 = (pparams[k] for k in ("w1", "b1", "w2", "b2", "w3", "b3"))
    B, in_dim = x.shape
    hp = w1.shape[1]
    op = w3.shape[1]  # lane-dense padded output width (128)

    flops = 2 * B * (in_dim * hp + hp * hp + hp * op)
    bytes_accessed = (
        x.size * x.dtype.itemsize
        + sum(a.size * a.dtype.itemsize for a in (w1, b1, w2, b2, w3, b3))
        + B * op * 4
    )
    cost = pl.CostEstimate(flops=flops, transcendentals=0, bytes_accessed=bytes_accessed)

    out_shape = jax.ShapeDtypeStruct((B, op), jnp.float32)
    args = (x, w1, b1, w2, b2, w3, b3)

    if batch_tile is None or B <= batch_tile:
        # Whole problem fits in one VMEM block: single grid point, fully fused.
        out = pl.pallas_call(
            _mlp_kernel,
            out_shape=out_shape,
            in_specs=[pl.BlockSpec(memory_space=pltpu.VMEM)] * 7,
            out_specs=pl.BlockSpec(memory_space=pltpu.VMEM),
            compiler_params=pltpu.CompilerParams(vmem_limit_bytes=32 << 20),
            cost_estimate=cost,
        )(*args)
    else:
        # Batch grid: weights/biases use a constant index_map so they stay
        # resident in VMEM across grid steps; batch axis is "parallel" so a
        # dual-TensorCore chip splits the (few) tiles across cores.
        def _resident(a):
            return pl.BlockSpec(a.shape, lambda i: (0, 0))

        out = pl.pallas_call(
            _mlp_kernel,
            out_shape=out_shape,
            grid=(pl.cdiv(B, batch_tile),),
            in_specs=[
                pl.BlockSpec((batch_tile, in_dim), lambda i: (i, 0)),
                _resident(w1), _resident(b1),
                _resident(w2), _resident(b2),
                _resident(w3), _resident(b3),
            ],
            out_specs=pl.BlockSpec((batch_tile, op), lambda i: (i, 0)),
            compiler_params=pltpu.CompilerParams(
                dimension_semantics=("parallel",), vmem_limit_bytes=32 << 20),
            cost_estimate=cost,
        )(*args)

    # Lane-dense kernel output -> slice back to the model's natural out_dim.
    return out[:, :out_dim]


def network_forward(x, pparams):
    """x: [B, in_dim] float32. pparams: output of prepare_params."""
    out_dim = pparams["out_dim"]
    arrays = {k: v for k, v in pparams.items() if k != "out_dim"}
    batch_tile = _choose_batch_tile(x.shape[0])
    return _forward_jit(x, arrays, out_dim=out_dim, batch_tile=batch_tile)


# ---------------------------------------------------------------------------
# Init + references
# ---------------------------------------------------------------------------
def init_params(key, in_dim, out_dim, hidden=64):
    """Deterministic init mimicking PyTorch nn.Linear default (U(-1/sqrt(fan_in), +))."""
    ks = jax.random.split(key, 6)

    def lin(kw, kb, fan_in, fan_out):
        bound = 1.0 / jnp.sqrt(fan_in)
        w = jax.random.uniform(kw, (fan_in, fan_out), jnp.float32, -bound, bound)
        b = jax.random.uniform(kb, (fan_out,), jnp.float32, -bound, bound)
        return w, b

    w1, b1 = lin(ks[0], ks[1], in_dim, hidden)
    w2, b2 = lin(ks[2], ks[3], hidden, hidden)
    w3, b3 = lin(ks[4], ks[5], hidden, out_dim)
    return {"w1": w1, "b1": b1, "w2": w2, "b2": b2, "w3": w3, "b3": b3}


def _reference_forward(x, params):
    hi = jax.lax.Precision.HIGHEST
    h1 = jnp.maximum(jnp.dot(x, params["w1"], precision=hi) + params["b1"], 0.0)
    h2 = jnp.maximum(jnp.dot(h1, params["w2"], precision=hi) + params["b2"], 0.0)
    return jnp.dot(h2, params["w3"], precision=hi) + params["b3"]


def _reference_forward_bf16(x, params):
    # Emulates the kernel's numerics: bf16 matmul operands, f32 accumulation.
    hi = jax.lax.Precision.HIGHEST
    f = lambda v: v.astype(jnp.bfloat16).astype(jnp.float32)
    h1 = jnp.maximum(jnp.dot(f(x), f(params["w1"]), precision=hi) + params["b1"], 0.0)
    h2 = jnp.maximum(jnp.dot(f(h1), f(params["w2"]), precision=hi) + params["b2"], 0.0)
    return jnp.dot(f(h2), f(params["w3"]), precision=hi) + params["b3"]


if __name__ == "__main__":
    # turtlebot3 DQN: state dim 26, action dim 5, tiny inference batch.
    in_dim, out_dim, batch = 26, 5, 4

    key = jax.random.PRNGKey(0)
    kx, kp, kb = jax.random.split(key, 3)
    x = jax.random.normal(kx, (batch, in_dim), jnp.float32)
    params = init_params(kp, in_dim, out_dim)

    # One-time packing (padding + bf16 cast) -- NOT in the per-call path.
    pparams = prepare_params(params)

    # Small-batch (single VMEM block) path.
    out = jax.block_until_ready(network_forward(x, pparams))
    assert out.shape == (batch, out_dim), out.shape
    ref_bf16 = _reference_forward_bf16(x, params)
    assert jnp.allclose(out, ref_bf16, atol=5e-3, rtol=5e-3), "mismatch vs bf16 reference"
    ref_f32 = _reference_forward(x, params)
    assert jnp.allclose(out, ref_f32, atol=5e-2, rtol=5e-2), "mismatch vs f32 reference"

    # Larger batch: path depends on the chip generation (2 maximal tiles on
    # dual-TensorCore chips, one resident block on single-TensorCore chips).
    big_b = 2048
    xb = jax.random.normal(kb, (big_b, in_dim), jnp.float32)
    outb = jax.block_until_ready(network_forward(xb, pparams))
    assert outb.shape == (big_b, out_dim), outb.shape
    refb = _reference_forward_bf16(xb, params)
    assert jnp.allclose(outb, refb, atol=5e-3, rtol=5e-3), "mismatch vs bf16 reference"

    # Explicitly exercise the tiled (grid) path regardless of chip generation.
    arrays = {k: v for k, v in pparams.items() if k != "out_dim"}
    outt = jax.block_until_ready(
        _forward_jit(xb, arrays, out_dim=out_dim, batch_tile=512))
    assert outt.shape == (big_b, out_dim), outt.shape
    assert jnp.allclose(outt, refb, atol=5e-3, rtol=5e-3), "mismatch vs bf16 reference (tiled)"

    print("KERNEL_OK")
</pallas_src>

<mosaic_0001>
module attributes {stable_mosaic.version = 11 : i64} {
  func.func @_mlp_kernel(%arg0: memref<4x26xf32, #tpu.memory_space<vmem>>, %arg1: memref<26x128xbf16, #tpu.memory_space<vmem>>, %arg2: memref<1x128xf32, #tpu.memory_space<vmem>>, %arg3: memref<128x128xbf16, #tpu.memory_space<vmem>>, %arg4: memref<1x128xf32, #tpu.memory_space<vmem>>, %arg5: memref<128x128xbf16, #tpu.memory_space<vmem>>, %arg6: memref<1x128xf32, #tpu.memory_space<vmem>>, %arg7: memref<4x128xf32, #tpu.memory_space<vmem>>) attributes {dimension_semantics = [], scalar_prefetch = 0 : i64, scratch_operands = 0 : i64, tpu.core_type = #tpu.core_type<tc>} {
    %c0 = arith.constant 0 : index
    %c0_0 = arith.constant 0 : index
    %0 = vector.load %arg0[%c0, %c0_0] : memref<4x26xf32, #tpu.memory_space<vmem>>, vector<4x26xf32>
    %1 = arith.truncf %0 : vector<4x26xf32> to vector<4x26xbf16>
    %c0_1 = arith.constant 0 : index
    %c0_2 = arith.constant 0 : index
    %2 = vector.load %arg1[%c0_1, %c0_2] : memref<26x128xbf16, #tpu.memory_space<vmem>>, vector<26x128xbf16>
    %cst = arith.constant dense<0.000000e+00> : vector<4x128xf32>
    %3 = tpu.matmul %1, %2, %cst {dimension_numbers = #tpu.dot_dimension_numbers<[1], [0], [0], [1], [0, 0, 1, 1], [], []>} : vector<4x26xbf16>, vector<26x128xbf16>, vector<4x128xf32> -> vector<4x128xf32>
    %c0_3 = arith.constant 0 : index
    %c0_4 = arith.constant 0 : index
    %4 = vector.load %arg2[%c0_3, %c0_4] : memref<1x128xf32, #tpu.memory_space<vmem>>, vector<1x128xf32>
    %5 = vector.broadcast %4 : vector<1x128xf32> to vector<4x128xf32>
    %6 = arith.addf %3, %5 : vector<4x128xf32>
    %cst_5 = arith.constant 0.000000e+00 : f32
    %7 = vector.broadcast %cst_5 : f32 to vector<4x128xf32>
    %8 = arith.maximumf %6, %7 : vector<4x128xf32>
    %9 = arith.truncf %8 : vector<4x128xf32> to vector<4x128xbf16>
    %c0_6 = arith.constant 0 : index
    %c0_7 = arith.constant 0 : index
    %10 = vector.load %arg3[%c0_6, %c0_7] : memref<128x128xbf16, #tpu.memory_space<vmem>>, vector<128x128xbf16>
    %cst_8 = arith.constant dense<0.000000e+00> : vector<4x128xf32>
    %11 = tpu.matmul %9, %10, %cst_8 {dimension_numbers = #tpu.dot_dimension_numbers<[1], [0], [0], [1], [0, 0, 1, 1], [], []>} : vector<4x128xbf16>, vector<128x128xbf16>, vector<4x128xf32> -> vector<4x128xf32>
    %c0_9 = arith.constant 0 : index
    %c0_10 = arith.constant 0 : index
    %12 = vector.load %arg4[%c0_9, %c0_10] : memref<1x128xf32, #tpu.memory_space<vmem>>, vector<1x128xf32>
    %13 = vector.broadcast %12 : vector<1x128xf32> to vector<4x128xf32>
    %14 = arith.addf %11, %13 : vector<4x128xf32>
    %cst_11 = arith.constant 0.000000e+00 : f32
    %15 = vector.broadcast %cst_11 : f32 to vector<4x128xf32>
    %16 = arith.maximumf %14, %15 : vector<4x128xf32>
    %17 = arith.truncf %16 : vector<4x128xf32> to vector<4x128xbf16>
    %c0_12 = arith.constant 0 : index
    %c0_13 = arith.constant 0 : index
    %18 = vector.load %arg5[%c0_12, %c0_13] : memref<128x128xbf16, #tpu.memory_space<vmem>>, vector<128x128xbf16>
    %cst_14 = arith.constant dense<0.000000e+00> : vector<4x128xf32>
    %19 = tpu.matmul %17, %18, %cst_14 {dimension_numbers = #tpu.dot_dimension_numbers<[1], [0], [0], [1], [0, 0, 1, 1], [], []>} : vector<4x128xbf16>, vector<128x128xbf16>, vector<4x128xf32> -> vector<4x128xf32>
    %c0_15 = arith.constant 0 : index
    %c0_16 = arith.constant 0 : index
    %20 = vector.load %arg6[%c0_15, %c0_16] : memref<1x128xf32, #tpu.memory_space<vmem>>, vector<1x128xf32>
    %21 = vector.broadcast %20 : vector<1x128xf32> to vector<4x128xf32>
    %22 = arith.addf %19, %21 : vector<4x128xf32>
    %c0_17 = arith.constant 0 : index
    %c0_18 = arith.constant 0 : index
    %23 = vector.load %arg7[%c0_17, %c0_18] : memref<4x128xf32, #tpu.memory_space<vmem>>, vector<4x128xf32>
    tpu.vector_store %arg7[%c0_17, %c0_18], %22 {strides = array<i32>} : memref<4x128xf32, #tpu.memory_space<vmem>>, vector<4x128xf32>,
    return
  }
}

</mosaic_0001>

<bundles_post_ra>
// kernel: _forward_jit.1
= control target key start
LH: loop header
LB: loop body
LE: loop exit
PB: predicated region body
PF: predicated region fallthrough
CT: control target
= control target key end

     0   :  { %12 = vsyncpa [#allocation3], 0  ;;  %s784_s0 = inlined_call_operand.hbm [shape: f32[4,26], index: 0, kind: input, shape index: {}]   ;;  %s785_s1 = inlined_call_operand.hbm [shape: bf16[26,128], index: 1, kind: input, shape index: {}]   ;;  %s786_s2 = inlined_call_operand.vmem [shape: f32[1,128], index: 2, kind: input, shape index: {}]   ;;  %s787_s3 = inlined_call_operand.hbm [shape: bf16[128,128], index: 3, kind: input, shape index: {}]   ;;  %s788_s4 = inlined_call_operand.vmem [shape: f32[1,128], index: 4, kind: input, shape index: {}]   ;;  %s789_s5 = inlined_call_operand.hbm [shape: bf16[128,128], index: 5, kind: input, shape index: {}]   ;;  %s790_s6 = inlined_call_operand.vmem [shape: f32[1,128], index: 6, kind: input, shape index: {}]   ;;  %s791_s7 = inlined_call_operand.hbm [shape: f32[4,128], index: 7, kind: output, shape index: {}]  }
   0x1   :  { %13 = vsyncpa [#allocation6], 0 }
   0x2   :  { %14 = vsyncpa [#allocation9], 0 }
   0x3   :  { %15 = vsyncpa [#allocation4], 0  ;;  %s633_s24 = smov [#allocation5]   ;;  %s515_s28 = scalar_lea.hbm %s785_s1, 256 }
   0x4   :  { %s31_s25 = sshll.u32 %s633_s24, 4  ;;  %p516_p0 = scmp.ne.s32.totalorder %s785_s1, %s515_s28  ;;  %s32_s25 = int_to_ptr.vmem [resolvable:$true] %s31_s25 }
   0x5   :  { %p519_p1 = scmp.lt.u32.totalorder %s515_s28, %s785_s1 }
   0x7   :  { %p521_p2 = pnand %p519_p1, %p516_p0 }
   0x9   :  { %524 = shalt.err (!%p521_p2)
}
   0xa   :  { %s525_s10 = scalar_lea.vmem %s32_s25, 256  ;;  %p530_p4 = scmp.lt.s32.totalorder %s32_s25, %s32_s25 }
   0xb   :  { %p526_p3 = scmp.ne.s32.totalorder %s32_s25, %s525_s10  ;;  %p531_p5 = scmp.lt.s32.totalorder %s525_s10, %s525_s10 }
   0xd   :  { %p532_p6 = por %p531_p5, %p530_p4 }
   0xf   :  { %p533_p7 = pnand %p532_p6, %p526_p3 }
  0x11   :  { %536 = shalt.err (!%p533_p7)
}
  0x12   :  { %s634_s11 = smov 64   ;;  %s635_s12 = smov 4  }
  0x13   :  { %37 = dma.hbm_to_vmem [thread:$0]  %s785_s1, 256, %s32_s25, [#allocation6], %s634_s11, %s634_s11, %s635_s12  }
  0x14   :  { %s636_s15 = smov [#allocation2]   ;;  %s637_s17 = smov [#allocation7]  }
  0x15   :  { %s22_s16 = sshll.u32 %s636_s15, 4  ;;  %s45_s18 = sshll.u32 %s637_s17, 4  ;;  %s23_s16 = int_to_ptr.vmem [resolvable:$true] %s22_s16  ;;  %s46_s18 = int_to_ptr.vmem [resolvable:$true] %s45_s18 }
  0x16   :  { %s537_s21 = scalar_lea.hbm %s784_s0, 64 }
  0x17   :  { %p538_p8 = scmp.ne.s32.totalorder %s784_s0, %s537_s21  ;;  %p541_p9 = scmp.lt.u32.totalorder %s537_s21, %s784_s0 }
  0x19   :  { %p543_p10 = pnand %p541_p9, %p538_p8 }
  0x1b   :  { %546 = shalt.err (!%p543_p10)
}
  0x1c   :  { %s547_s1 = scalar_lea.vmem %s23_s16, 64  ;;  %p552_p12 = scmp.lt.s32.totalorder %s23_s16, %s23_s16 }
  0x1d   :  { %p548_p11 = scmp.ne.s32.totalorder %s23_s16, %s547_s1  ;;  %p553_p13 = scmp.lt.s32.totalorder %s547_s1, %s547_s1 }
  0x1f   :  { %p554_p0 = por %p553_p13, %p552_p12 }
  0x21   :  { %p555_p1 = pnand %p554_p0, %p548_p11 }
  0x23   :  { %558 = shalt.err (!%p555_p1)
}
  0x24   :  { %25 = dma.hbm_to_vmem [thread:$0]  %s784_s0, 64, %s23_s16, [#allocation3]  }
  0x25   :  { %s559_s30 = scalar_lea.hbm %s787_s3, 1024 }
  0x26   :  { %p560_p2 = scmp.ne.s32.totalorder %s787_s3, %s559_s30  ;;  %p563_p3 = scmp.lt.u32.totalorder %s559_s30, %s787_s3 }
  0x28   :  { %p565_p4 = pnand %p563_p3, %p560_p2 }
  0x2a   :  { %568 = shalt.err (!%p565_p4)
}
  0x2b   :  { %s569_s14 = scalar_lea.vmem %s46_s18, 1024  ;;  %p574_p6 = scmp.lt.s32.totalorder %s46_s18, %s46_s18 }
  0x2c   :  { %p570_p5 = scmp.ne.s32.totalorder %s46_s18, %s569_s14  ;;  %p575_p7 = scmp.lt.s32.totalorder %s569_s14, %s569_s14 }
  0x2e   :  { %p576_p8 = por %p575_p7, %p574_p6 }
  0x30   :  { %p577_p9 = pnand %p576_p8, %p570_p5 }
  0x32   :  { %580 = shalt.err (!%p577_p9)
}
  0x33   :  { %51 = dma.hbm_to_vmem [thread:$0]  %s787_s3, 1024, %s46_s18, [#allocation6], %s634_s11, %s634_s11, %s635_s12  }
  0x34   :  { %s638_s16 = smov [#allocation8]   ;;  %s581_s21 = scalar_lea.hbm %s789_s5, 1024 }
  0x35   :  { %s59_s17 = sshll.u32 %s638_s16, 4  ;;  %p582_p10 = scmp.ne.s32.totalorder %s789_s5, %s581_s21  ;;  %s60_s17 = int_to_ptr.vmem [resolvable:$true] %s59_s17 }
  0x36   :  { %p585_p11 = scmp.lt.u32.totalorder %s581_s21, %s789_s5 }
  0x38   :  { %p587_p12 = pnand %p585_p11, %p582_p10 }
  0x3a   :  { %590 = shalt.err (!%p587_p12)
}
  0x3b   :  { %s591_s1 = scalar_lea.vmem %s60_s17, 1024  ;;  %p596_p0 = scmp.lt.s32.totalorder %s60_s17, %s60_s17 }
  0x3c   :  { %p592_p13 = scmp.ne.s32.totalorder %s60_s17, %s591_s1  ;;  %p597_p1 = scmp.lt.s32.totalorder %s591_s1, %s591_s1 }
  0x3e   :  { %p598_p2 = por %p597_p1, %p596_p0 }
  0x40   :  { %p599_p3 = pnand %p598_p2, %p592_p13 }
  0x42   :  { %602 = shalt.err (!%p599_p3)
}
  0x43   :  { %65 = dma.hbm_to_vmem [thread:$0]  %s789_s5, 1024, %s60_s17, [#allocation9], %s634_s11, %s634_s11, %s635_s12  }
  0x44   :  { %625 = dma.done.wait [#allocation3], 64  }
  0x45   :  { %626 = vsyncadd [#allocation3], 4294967232 }
  0x46   :  { %627 = dma.done.wait [#allocation6], 1280  }
  0x47   :  { %628 = vsyncadd [#allocation6], 4294966016 }
  0x48   :  { %629 = dma.done.wait [#allocation9], 1024  }
  0x49   :  { %630 = vsyncadd [#allocation9], 4294966272  ;;  %v639_v0 = vmov 0.0   ;;  %vm640_vm0 = vmmov 0   ;;  %v497_v1 = vld [vmem:[#allocation5] sm:$0xff]   ;;  %vm109_vm1 = vcmask 1044480  }
  0x4a   :  { %440 = vmatprep.subr.bf16.mxu0 %v639_v0  ;;  %444 = vmatprep.mubr.msk.bf16.mxu0 %vm640_vm0, %v639_v0  ;;  %v498_v2 = vld [vmem:[#allocation5 + $0x8] sm:$0x1f]   ;;  %v81_v3 = vld [vmem:[#allocation2] sm:$0xf]  ;;  %v499_v5 = vld [vmem:[#allocation7] sm:$0xff]   ;;  %vm105_vm2 = vcmask 211968  }
  0x4b   :  { %448 = vmatprep.subr.bf16.mxu1 %v639_v0  ;;  %464 = vmatprep.mubr.msk.bf16.mxu1 %vm640_vm0, %v639_v0  ;;  %v111_v4 = vsel %vm109_vm1, %v498_v2, 0  ;;  %v82_v6 = vpack.c.bf16 %v81_v3, %v81_v3  ;;  %v500_v7 = vld [vmem:[#allocation7 + $0x8] sm:$0xff]   ;;  %v501_v8 = vld [vmem:[#allocation7 + $0x10] sm:$0xff]   ;;  %v502_v9 = vld [vmem:[#allocation7 + $0x18] sm:$0xff]   ;;  %s641_s28 = smov [#allocation10]  }
  0x4c   :  { %441 = vmatpush3.bf16.msra.mxu0 %v497_v1  ;;  %449 = vmatpush3.bf16.msra.mxu1 %v499_v5  ;;  %v503_v10 = vld [vmem:[#allocation7 + $0x20] sm:$0xff]   ;;  %v504_v11 = vld [vmem:[#allocation7 + $0x28] sm:$0xff]   ;;  %v505_v12 = vld [vmem:[#allocation7 + $0x30] sm:$0xff]   ;;  %s386_s29 = sshll.u32 %s641_s28, 4  ;;  %s387_s29 = int_to_ptr.vmem [resolvable:$true] %s386_s29 }
  0x4d   :  { %442 = vmatprep.subr.bf16.mxu0 %v639_v0  ;;  %450 = vmatprep.subr.bf16.mxu1 %v639_v0  ;;  %v506_v13 = vld [vmem:[#allocation7 + $0x38] sm:$0xff]   ;;  %v507_v14 = vld [vmem:[#allocation8] sm:$0xff]   ;;  %v508_v15 = vld [vmem:[#allocation8 + $0x8] sm:$0xff]   ;;  %p608_p5 = scmp.lt.s32.totalorder %s387_s29, %s387_s29 }
  0x4e   :  { %v509_v16 = vld [vmem:[#allocation8 + $0x10] sm:$0xff]   ;;  %v510_v17 = vld [vmem:[#allocation8 + $0x18] sm:$0xff]   ;;  %v511_v18 = vld [vmem:[#allocation8 + $0x20] sm:$0xff]  }
  0x4f   :  { %v512_v19 = vld [vmem:[#allocation8 + $0x28] sm:$0xff]   ;;  %v513_v28 = vld [vmem:[#allocation8 + $0x30] sm:$0xff]   ;;  %v514_v29 = vld [vmem:[#allocation8 + $0x38] sm:$0xff]  }
  0x50   :  { %443 = vmatpush3.bf16.msra.mxu0 %v111_v4  ;;  %451 = vmatpush3.bf16.msra.mxu1 %v500_v7  ;;  %v397_v20 = vld [vmem:[%s786_s2] ss:$0 sm:$0xff] }
  0x51   :  { %468 = vmatprep.subr.bf16.mxu0 %v639_v0  ;;  %452 = vmatprep.subr.bf16.mxu1 %v639_v0  ;;  %v401_v30 = vld [vmem:[%s788_s4] ss:$0 sm:$0xff]  ;;  %s603_s4 = scalar_lea.vmem %s387_s29, 64 }
  0x52   :  { %v410_v38 = vld [vmem:[%s790_s6] ss:$0 sm:$0xff]  ;;  %p604_p4 = scmp.ne.s32.totalorder %s387_s29, %s603_s4  ;;  %p609_p6 = scmp.lt.s32.totalorder %s603_s4, %s603_s4 }
  0x53   :  { %445 = vmatmul.mubr.msk.bf16.vlgmr.msra.gmra.mrb[0].mxu0 %vm105_vm2, %v82_v6 }
  0x54   :  { %484 = vmatprep.mubr.msk.bf16.mxu0 %vm640_vm0, %v639_v0  ;;  %453 = vmatpush3.bf16.msra.mxu1 %v501_v8  ;;  %p610_p7 = por %p609_p6, %p608_p5 }
  0x55   :  { %454 = vmatprep.subr.bf16.mxu1 %v639_v0  ;;  %469 = vmatpush3.bf16.msra.mxu0 %v507_v14 }
  0x56   :  { %470 = vmatprep.subr.bf16.mxu0 %v639_v0  ;;  %p611_p8 = pnand %p610_p7, %p604_p4 }
  0x58   :  { %455 = vmatpush3.bf16.msra.mxu1 %v502_v9 }
  0x59   :  { %456 = vmatprep.subr.bf16.mxu1 %v639_v0  ;;  %471 = vmatpush3.bf16.msra.mxu0 %v508_v15 }
  0x5a   :  { %472 = vmatprep.subr.bf16.mxu0 %v639_v0 }
  0x5c   :  { %457 = vmatpush3.bf16.msra.mxu1 %v503_v10 }
  0x5d   :  { %458 = vmatprep.subr.bf16.mxu1 %v639_v0  ;;  %473 = vmatpush3.bf16.msra.mxu0 %v509_v16 }
  0x5e   :  { %474 = vmatprep.subr.bf16.mxu0 %v639_v0 }
  0x60   :  { %459 = vmatpush3.bf16.msra.mxu1 %v504_v11 }
  0x61   :  { %460 = vmatprep.subr.bf16.mxu1 %v639_v0  ;;  %475 = vmatpush3.bf16.msra.mxu0 %v510_v17 }
  0x62   :  { %476 = vmatprep.subr.bf16.mxu0 %v639_v0 }
  0x64   :  { %461 = vmatpush3.bf16.msra.mxu1 %v505_v12 }
  0x65   :  { %462 = vmatprep.subr.bf16.mxu1 %v639_v0  ;;  %477 = vmatpush3.bf16.msra.mxu0 %v511_v18 }
  0x66   :  { %478 = vmatprep.subr.bf16.mxu0 %v639_v0 }
  0x68   :  { %463 = vmatpush3.bf16.msra.mxu1 %v506_v13 }
  0x69   :  { %479 = vmatpush3.bf16.msra.mxu0 %v512_v19 }
  0x6a   :  { %480 = vmatprep.subr.bf16.mxu0 %v639_v0 }
  0x6d   :  { %481 = vmatpush3.bf16.msra.mxu0 %v513_v28 }
  0x6e   :  { %482 = vmatprep.subr.bf16.mxu0 %v639_v0 }
  0x71   :  { %483 = vmatpush3.bf16.msra.mxu0 %v514_v29 }
 0x126   :  { %v147_v21 = vpop.f32.mrb[0].mxu0 }
 0x127   :  { %v148_v22 = vadd.f32 %v397_v20, %v147_v21  ;;  %v446_v23 = vpop.f32.mrb[1].mxu0 }
 0x128   :  { %v150_v24 = vpop.f32.mrb[2].mxu0 }
 0x129   :  { %v153_v25 = vmax.f32 %v148_v22, 0.0  ;;  %v447_v26 = vpop.f32.mrb[3].mxu0 }
 0x12b   :  { %v154_v27 = vpack.c.bf16 %v153_v25, %v153_v25 }
 0x12d   :  { %465 = vmatmul.mubr.bf16.vlgmr.msra.gmra.mrb[0].mxu1 %v154_v27 }
 0x200   :  { %v260_v31 = vpop.f32.mrb[0].mxu1 }
 0x201   :  { %v261_v32 = vadd.f32 %v401_v30, %v260_v31  ;;  %v466_v33 = vpop.f32.mrb[1].mxu1 }
 0x202   :  { %v263_v34 = vpop.f32.mrb[2].mxu1 }
 0x203   :  { %v266_v35 = vmax.f32 %v261_v32, 0.0  ;;  %v467_v36 = vpop.f32.mrb[3].mxu1 }
 0x205   :  { %v267_v37 = vpack.c.bf16 %v266_v35, %v266_v35 }
 0x207   :  { %485 = vmatmul.mubr.bf16.vlgmr.msra.gmra.mrb[4].mxu0 %v267_v37 }
 0x2da   :  { %v373_v39 = vpop.f32.mrb[4].mxu0 }
 0x2db   :  { %v374_v40 = vadd.f32 %v410_v38, %v373_v39  ;;  %v486_v41 = vpop.f32.mrb[5].mxu0 }
 0x2dc   :  { %v376_v42 = vpop.f32.mrb[6].mxu0 }
 0x2dd   :  { %379 = vst [vmem:[#allocation10] sm:$0xf] %v374_v40  ;;  %v487_v43 = vpop.f32.mrb[7].mxu0 }
 0x2de   :  { %614 = shalt.err (!%p611_p8)
}
 0x2df   :  { %s615_s6 = scalar_lea.hbm %s791_s7, 64 }
 0x2e0   :  { %p616_p9 = scmp.ne.s32.totalorder %s791_s7, %s615_s6  ;;  %p619_p10 = scmp.lt.u32.totalorder %s615_s6, %s791_s7 }
 0x2e2   :  { %p621_p11 = pnand %p619_p10, %p616_p9 }
 0x2e4   :  { %624 = shalt.err (!%p621_p11)
}
 0x2e5   :  { %389 = dma.vmem_to_hbm [thread:$0]  %s387_s29, 64, %s791_s7, [#allocation4]  }
 0x2e6   :  { %631 = dma.done.wait [#allocation4], 64  }
 0x2e7   :  { %632 = vsyncadd [#allocation4], 4294967232 }
 0x2e8   :  { %393 = vsyncpa [#allocation3], 1 }
 0x2e9   :  { %394 = vsyncpa [#allocation6], 1 }
 0x2ea   :  { %395 = vsyncpa [#allocation9], 1 }
 0x2eb   :  { %396 = vsyncpa [#allocation4], 1 }

</bundles_post_ra>
